<compile_context>
chip_gen: v5e
topology: v5e:2x2
jax: 0.10.0
libtpu: 0.0.40
codegen_flags: <defaults>
</compile_context>

<pallas_src>
import functools

import jax
import jax.numpy as jnp
from jax.experimental import pallas as pl
from jax.experimental.pallas import tpu as pltpu

MARGIN = 2.0
EPS = 1e-6  # F.pairwise_distance default eps (added to the difference, like PyTorch)


def _round_up(x, m):
    return (x + m - 1) // m * m


def _contrastive_loss_kernel(img_ref, txt_ref, gt_ref, out_ref,
                             cross_acc, ai_acc, bj_acc, loss_acc,
                             *, margin, eps, n_true, d_true, tm, tn, need_mask):
    i = pl.program_id(0)
    j = pl.program_id(1)
    k = pl.program_id(2)
    nk = pl.num_programs(2)

    # Zero the global scalar accumulator on the very first grid step.
    @pl.when((i == 0) & (j == 0) & (k == 0))
    def _():
        loss_acc[...] = jnp.zeros_like(loss_acc)

    # Reset per-(i, j) partial-distance accumulators at the start of the k reduction.
    @pl.when(k == 0)
    def _():
        cross_acc[...] = jnp.zeros_like(cross_acc)
        ai_acc[...] = jnp.zeros_like(ai_acc)
        bj_acc[...] = jnp.zeros_like(bj_acc)

    img = img_ref[...]                                   # (tm, tk), native dtype
    txt = txt_ref[...]                                   # (tn, tk), native dtype

    # Cross term <img_i, txt_j> on the MXU (partial over this k block).
    cross_acc[...] += jax.lax.dot_general(
        img, txt, (((1,), (1,)), ((), ())),
        preferred_element_type=jnp.float32)

    img_f = img.astype(jnp.float32)
    txt_f = txt.astype(jnp.float32)

    # Row terms:  a_i = ||img_i||^2 + 2*eps*sum(img_i)  as a (tm, 1) column,
    #             b_j = ||txt_j||^2 - 2*eps*sum(txt_j)  as a (1, tn) row
    #             (row layout produced via a ones-matmul to stay lane-dense).
    ai_acc[...] += jnp.sum(img_f * img_f + (2.0 * eps) * img_f,
                           axis=1, keepdims=True)
    ones_row = jnp.ones((1, txt_f.shape[1]), jnp.float32)
    bj_acc[...] += jax.lax.dot_general(
        ones_row, txt_f * txt_f - (2.0 * eps) * txt_f,
        (((1,), (1,)), ((), ())),
        preferred_element_type=jnp.float32)

    # Finish this (i, j) tile once the k reduction is complete.
    @pl.when(k == nk - 1)
    def _():
        gt = gt_ref[...].astype(jnp.float32)             # (tm, tn)
        d2 = (ai_acc[...] + bj_acc[...] - 2.0 * cross_acc[...]
              + jnp.float32(d_true * eps * eps))
        d2 = jnp.maximum(d2, 0.0)                        # guard fp cancellation
        dist = jnp.sqrt(d2)
        hinge = jnp.maximum(margin - dist, 0.0)
        per = (1.0 - gt) * d2 + gt * (hinge * hinge)
        if need_mask:                                    # static: only if N was padded
            row = i * tm + jax.lax.broadcasted_iota(jnp.int32, per.shape, 0)
            col = j * tn + jax.lax.broadcasted_iota(jnp.int32, per.shape, 1)
            per = jnp.where((row < n_true) & (col < n_true), per, 0.0)
        loss_acc[...] += jnp.sum(per)

    # Single store of the final scalar:  sum_i mean_j  ==  total / n_true.
    @pl.when((i == pl.num_programs(0) - 1)
             & (j == pl.num_programs(1) - 1)
             & (k == nk - 1))
    def _():
        out_ref[...] = loss_acc[...] * jnp.float32(1.0 / n_true)


def contrastive_loss(image_embedding, text_embedding, ground_truth, margin=MARGIN):
    n = image_embedding.shape[0]
    img = image_embedding.reshape(n, -1)                 # .view(1, -1) flatten per row
    txt = text_embedding.reshape(n, -1)
    d = img.shape[1]

    # ---- tile sizing: (8,128)/MXU aligned, VMEM friendly on v5e/v6e/v7x ----
    n_sub = _round_up(n, 8)
    if n_sub <= 256:
        tm = tn = n_sub
        n_pad = n_sub
    else:
        tm = tn = 256
        n_pad = _round_up(n, 256)
    d_pad = _round_up(d, 128)
    if d_pad <= 512:
        tk = d_pad
    elif d_pad % 512 == 0:
        tk = 512
    elif d_pad % 256 == 0:
        tk = 256
    else:
        tk = 128

    # Zero padding is exact here: padded features contribute nothing to the matmul
    # identity (the D*eps^2 / mean corrections use the true d and n), and padded
    # rows/cols are masked inside the kernel.
    img_p = jnp.pad(img, ((0, n_pad - n), (0, d_pad - d)))
    txt_p = jnp.pad(txt, ((0, n_pad - n), (0, d_pad - d)))
    gt_p = jnp.pad(ground_truth, ((0, n_pad - n), (0, n_pad - n)))

    grid = (n_pad // tm, n_pad // tn, d_pad // tk)       # reduction axis (k) last
    kernel = functools.partial(
        _contrastive_loss_kernel, margin=float(margin), eps=EPS,
        n_true=n, d_true=d, tm=tm, tn=tn, need_mask=(n_pad != n))

    in_bytes = (img_p.size * img_p.dtype.itemsize
                + txt_p.size * txt_p.dtype.itemsize
                + gt_p.size * gt_p.dtype.itemsize)

    out = pl.pallas_call(
        kernel,
        out_shape=jax.ShapeDtypeStruct((1, 1), jnp.float32),
        grid_spec=pltpu.PrefetchScalarGridSpec(
            num_scalar_prefetch=0,
            grid=grid,
            in_specs=[
                pl.BlockSpec((tm, tk), lambda i, j, k: (i, k)),   # image rows
                pl.BlockSpec((tn, tk), lambda i, j, k: (j, k)),   # text rows
                pl.BlockSpec((tm, tn), lambda i, j, k: (i, j)),   # ground truth
            ],
            out_specs=pl.BlockSpec((1, 1), lambda i, j, k: (0, 0)),
            scratch_shapes=[
                pltpu.VMEM((tm, tn), jnp.float32),   # cross-term accumulator over k
                pltpu.VMEM((tm, 1), jnp.float32),    # image row-term accumulator
                pltpu.VMEM((1, tn), jnp.float32),    # text row-term accumulator
                pltpu.VMEM((1, 1), jnp.float32),     # global scalar loss accumulator
            ]),
        compiler_params=pltpu.CompilerParams(
            # The scalar loss accumulator is carried across every grid step, so all
            # axes are a sequential reduction ("arbitrary"). Exploiting v7x megacore
            # would require per-core partial outputs summed in the wrapper.
            dimension_semantics=("arbitrary", "arbitrary", "arbitrary")),
        cost_estimate=pl.CostEstimate(
            flops=2 * n_pad * n_pad * d_pad,
            transcendentals=n_pad * n_pad,
            bytes_accessed=in_bytes + 4),
    )(img_p, txt_p, gt_p)
    return out[0, 0]


def _reference(image_embedding, text_embedding, ground_truth, margin=MARGIN):
    # Pure-JAX reference mirroring the PyTorch module (naive broadcast form).
    n = image_embedding.shape[0]
    img = image_embedding.reshape(n, -1)
    txt = text_embedding.reshape(n, -1)
    diff = img[:, None, :] - txt[None, :, :] + EPS
    dist = jnp.sqrt(jnp.sum(diff * diff, axis=-1))
    per = (1.0 - ground_truth) * dist ** 2 \
        + ground_truth * jnp.maximum(margin - dist, 0.0) ** 2
    return jnp.sum(jnp.mean(per, axis=1))


if __name__ == "__main__":
    N, D = 8, 32
    key = jax.random.PRNGKey(0)
    k1, k2, k3 = jax.random.split(key, 3)
    image_embedding = jax.random.normal(k1, (N, D), dtype=jnp.float32)
    text_embedding = jax.random.normal(k2, (N, D), dtype=jnp.float32)
    # Binary pairwise labels (similar / dissimilar), as expected by the loss.
    ground_truth = jax.random.bernoulli(k3, p=0.5, shape=(N, N)).astype(jnp.float32)

    loss = contrastive_loss(image_embedding, text_embedding, ground_truth)
    loss = jax.block_until_ready(loss)

    ref = _reference(image_embedding, text_embedding, ground_truth)
    # Tolerance allows for MXU default-precision matmul vs. the naive f32 reference.
    assert jnp.allclose(loss, ref, rtol=2e-3, atol=1e-2), (loss, ref)
    print("KERNEL_OK")
</pallas_src>

<mosaic_0001>
module attributes {stable_mosaic.version = 11 : i64} {
  func.func @_contrastive_loss_kernel(%arg0: i32, %arg1: i32, %arg2: i32, %arg3: memref<8x128xf32, #tpu.memory_space<vmem>>, %arg4: memref<8x128xf32, #tpu.memory_space<vmem>>, %arg5: memref<8x8xf32, #tpu.memory_space<vmem>>, %arg6: memref<1x1xf32, #tpu.memory_space<vmem>>, %arg7: memref<8x8xf32, #tpu.memory_space<vmem>>, %arg8: memref<8x1xf32, #tpu.memory_space<vmem>>, %arg9: memref<1x8xf32, #tpu.memory_space<vmem>>, %arg10: memref<1x1xf32, #tpu.memory_space<vmem>>) attributes {dimension_semantics = [#tpu.dimension_semantics<arbitrary>, #tpu.dimension_semantics<arbitrary>, #tpu.dimension_semantics<arbitrary>], iteration_bounds = array<i64: 1, 1, 1>, scalar_prefetch = 0 : i64, scratch_operands = 4 : i64, tpu.core_type = #tpu.core_type<tc>, window_params = [{transform_indices = @transform_0, window_bounds = array<i64: 8, 128>}, {transform_indices = @transform_1, window_bounds = array<i64: 8, 128>}, {transform_indices = @transform_2, window_bounds = array<i64: 8, 8>}, {pipeline_mode = #tpu.pipeline_mode<synchronous>, transform_indices = @transform_3, window_bounds = array<i64: 1, 1>}]} {
    %c0_i32 = arith.constant 0 : i32
    %0 = arith.cmpi eq, %arg0, %c0_i32 : i32
    %c0_i32_0 = arith.constant 0 : i32
    %1 = arith.cmpi eq, %arg1, %c0_i32_0 : i32
    %2 = arith.andi %0, %1 : i1
    %c0_i32_1 = arith.constant 0 : i32
    %3 = arith.cmpi eq, %arg2, %c0_i32_1 : i32
    %4 = arith.andi %2, %3 : i1
    %5 = arith.extui %4 : i1 to i32
    %c0_i32_2 = arith.constant 0 : i32
    %6 = arith.cmpi ne, %5, %c0_i32_2 : i32
    scf.if %6 {
      %cst_31 = arith.constant 0.000000e+00 : f32
      %44 = vector.broadcast %cst_31 : f32 to vector<1x1xf32>
      %c0_32 = arith.constant 0 : index
      %c0_33 = arith.constant 0 : index
      %45 = vector.load %arg10[%c0_32, %c0_33] : memref<1x1xf32, #tpu.memory_space<vmem>>, vector<1x1xf32>
      tpu.vector_store %arg10[%c0_32, %c0_33], %44 {strides = array<i32>} : memref<1x1xf32, #tpu.memory_space<vmem>>, vector<1x1xf32>,
    } else {
    }
    %c0_i32_3 = arith.constant 0 : i32
    %7 = arith.cmpi eq, %arg2, %c0_i32_3 : i32
    %8 = arith.extui %7 : i1 to i32
    %c0_i32_4 = arith.constant 0 : i32
    %9 = arith.cmpi ne, %8, %c0_i32_4 : i32
    scf.if %9 {
      %cst_31 = arith.constant 0.000000e+00 : f32
      %44 = vector.broadcast %cst_31 : f32 to vector<8x8xf32>
      %c0_32 = arith.constant 0 : index
      %c0_33 = arith.constant 0 : index
      %45 = vector.load %arg7[%c0_32, %c0_33] : memref<8x8xf32, #tpu.memory_space<vmem>>, vector<8x8xf32>
      tpu.vector_store %arg7[%c0_32, %c0_33], %44 {strides = array<i32>} : memref<8x8xf32, #tpu.memory_space<vmem>>, vector<8x8xf32>,
      %cst_34 = arith.constant 0.000000e+00 : f32
      %46 = vector.broadcast %cst_34 : f32 to vector<8x1xf32>
      %c0_35 = arith.constant 0 : index
      %c0_36 = arith.constant 0 : index
      %47 = vector.load %arg8[%c0_35, %c0_36] : memref<8x1xf32, #tpu.memory_space<vmem>>, vector<8x1xf32>
      tpu.vector_store %arg8[%c0_35, %c0_36], %46 {strides = array<i32>} : memref<8x1xf32, #tpu.memory_space<vmem>>, vector<8x1xf32>,
      %cst_37 = arith.constant 0.000000e+00 : f32
      %48 = vector.broadcast %cst_37 : f32 to vector<1x8xf32>
      %c0_38 = arith.constant 0 : index
      %c0_39 = arith.constant 0 : index
      %49 = vector.load %arg9[%c0_38, %c0_39] : memref<1x8xf32, #tpu.memory_space<vmem>>, vector<1x8xf32>
      tpu.vector_store %arg9[%c0_38, %c0_39], %48 {strides = array<i32>} : memref<1x8xf32, #tpu.memory_space<vmem>>, vector<1x8xf32>,
    } else {
    }
    %c0 = arith.constant 0 : index
    %c0_5 = arith.constant 0 : index
    %10 = vector.load %arg3[%c0, %c0_5] : memref<8x128xf32, #tpu.memory_space<vmem>>, vector<8x128xf32>
    %c0_6 = arith.constant 0 : index
    %c0_7 = arith.constant 0 : index
    %11 = vector.load %arg4[%c0_6, %c0_7] : memref<8x128xf32, #tpu.memory_space<vmem>>, vector<8x128xf32>
    %c0_8 = arith.constant 0 : index
    %c0_9 = arith.constant 0 : index
    %12 = vector.load %arg7[%c0_8, %c0_9] : memref<8x8xf32, #tpu.memory_space<vmem>>, vector<8x8xf32>
    %cst = arith.constant dense<0.000000e+00> : vector<8x8xf32>
    %13 = tpu.matmul %10, %11, %cst {dimension_numbers = #tpu.dot_dimension_numbers<[1], [1], [0], [0], [0, 0, 1, 0], [], []>} : vector<8x128xf32>, vector<8x128xf32>, vector<8x8xf32> -> vector<8x8xf32>
    %14 = arith.addf %12, %13 : vector<8x8xf32>
    %c0_10 = arith.constant 0 : index
    %c0_11 = arith.constant 0 : index
    %15 = vector.load %arg7[%c0_10, %c0_11] : memref<8x8xf32, #tpu.memory_space<vmem>>, vector<8x8xf32>
    tpu.vector_store %arg7[%c0_10, %c0_11], %14 {strides = array<i32>} : memref<8x8xf32, #tpu.memory_space<vmem>>, vector<8x8xf32>,
    %c0_12 = arith.constant 0 : index
    %c0_13 = arith.constant 0 : index
    %16 = vector.load %arg8[%c0_12, %c0_13] : memref<8x1xf32, #tpu.memory_space<vmem>>, vector<8x1xf32>
    %17 = arith.mulf %10, %10 : vector<8x128xf32>
    %cst_14 = arith.constant 2.000000e-06 : f32
    %18 = vector.broadcast %cst_14 : f32 to vector<8x128xf32>
    %19 = arith.mulf %18, %10 : vector<8x128xf32>
    %20 = arith.addf %17, %19 : vector<8x128xf32>
    %cst_15 = arith.constant dense<0.000000e+00> : vector<8xf32>
    %21 = vector.multi_reduction <add>, %20, %cst_15 [1] : vector<8x128xf32> to vector<8xf32>
    %22 = vector.shape_cast %21 : vector<8xf32> to vector<8x1xf32>
    %23 = arith.addf %16, %22 : vector<8x1xf32>
    %c0_16 = arith.constant 0 : index
    %c0_17 = arith.constant 0 : index
    %24 = vector.load %arg8[%c0_16, %c0_17] : memref<8x1xf32, #tpu.memory_space<vmem>>, vector<8x1xf32>
    tpu.vector_store %arg8[%c0_16, %c0_17], %23 {strides = array<i32>} : memref<8x1xf32, #tpu.memory_space<vmem>>, vector<8x1xf32>,
    %cst_18 = arith.constant 1.000000e+00 : f32
    %25 = vector.broadcast %cst_18 : f32 to vector<1x128xf32>
    %c0_19 = arith.constant 0 : index
    %c0_20 = arith.constant 0 : index
    %26 = vector.load %arg9[%c0_19, %c0_20] : memref<1x8xf32, #tpu.memory_space<vmem>>, vector<1x8xf32>
    %27 = arith.mulf %11, %11 : vector<8x128xf32>
    %cst_21 = arith.constant 2.000000e-06 : f32
    %28 = vector.broadcast %cst_21 : f32 to vector<8x128xf32>
    %29 = arith.mulf %28, %11 : vector<8x128xf32>
    %30 = arith.subf %27, %29 : vector<8x128xf32>
    %cst_22 = arith.constant dense<0.000000e+00> : vector<1x8xf32>
    %31 = tpu.matmul %25, %30, %cst_22 {dimension_numbers = #tpu.dot_dimension_numbers<[1], [1], [0], [0], [0, 0, 1, 0], [], []>} : vector<1x128xf32>, vector<8x128xf32>, vector<1x8xf32> -> vector<1x8xf32>
    %32 = arith.addf %26, %31 : vector<1x8xf32>
    %c0_23 = arith.constant 0 : index
    %c0_24 = arith.constant 0 : index
    %33 = vector.load %arg9[%c0_23, %c0_24] : memref<1x8xf32, #tpu.memory_space<vmem>>, vector<1x8xf32>
    tpu.vector_store %arg9[%c0_23, %c0_24], %32 {strides = array<i32>} : memref<1x8xf32, #tpu.memory_space<vmem>>, vector<1x8xf32>,
    %c0_i32_25 = arith.constant 0 : i32
    %34 = arith.cmpi eq, %arg2, %c0_i32_25 : i32
    %35 = arith.extui %34 : i1 to i32
    %c0_i32_26 = arith.constant 0 : i32
    %36 = arith.cmpi ne, %35, %c0_i32_26 : i32
    scf.if %36 {
      %c0_31 = arith.constant 0 : index
      %c0_32 = arith.constant 0 : index
      %44 = vector.load %arg5[%c0_31, %c0_32] : memref<8x8xf32, #tpu.memory_space<vmem>>, vector<8x8xf32>
      %c0_33 = arith.constant 0 : index
      %c0_34 = arith.constant 0 : index
      %45 = vector.load %arg8[%c0_33, %c0_34] : memref<8x1xf32, #tpu.memory_space<vmem>>, vector<8x1xf32>
      %c0_35 = arith.constant 0 : index
      %c0_36 = arith.constant 0 : index
      %46 = vector.load %arg9[%c0_35, %c0_36] : memref<1x8xf32, #tpu.memory_space<vmem>>, vector<1x8xf32>
      %47 = vector.broadcast %45 : vector<8x1xf32> to vector<8x8xf32>
      %48 = vector.broadcast %46 : vector<1x8xf32> to vector<8x8xf32>
      %49 = arith.addf %47, %48 : vector<8x8xf32>
      %c0_37 = arith.constant 0 : index
      %c0_38 = arith.constant 0 : index
      %50 = vector.load %arg7[%c0_37, %c0_38] : memref<8x8xf32, #tpu.memory_space<vmem>>, vector<8x8xf32>
      %cst_39 = arith.constant 2.000000e+00 : f32
      %51 = vector.broadcast %cst_39 : f32 to vector<8x8xf32>
      %52 = arith.mulf %51, %50 : vector<8x8xf32>
      %53 = arith.subf %49, %52 : vector<8x8xf32>
      %cst_40 = arith.constant 3.200000e-11 : f32
      %54 = vector.broadcast %cst_40 : f32 to vector<8x8xf32>
      %55 = arith.addf %53, %54 : vector<8x8xf32>
      %cst_41 = arith.constant 0.000000e+00 : f32
      %56 = vector.broadcast %cst_41 : f32 to vector<8x8xf32>
      %57 = arith.maximumf %55, %56 : vector<8x8xf32>
      %58 = math.sqrt %57 : vector<8x8xf32>
      %cst_42 = arith.constant 2.000000e+00 : f32
      %59 = vector.broadcast %cst_42 : f32 to vector<8x8xf32>
      %60 = arith.subf %59, %58 : vector<8x8xf32>
      %cst_43 = arith.constant 0.000000e+00 : f32
      %61 = vector.broadcast %cst_43 : f32 to vector<8x8xf32>
      %62 = arith.maximumf %60, %61 : vector<8x8xf32>
      %cst_44 = arith.constant 1.000000e+00 : f32
      %63 = vector.broadcast %cst_44 : f32 to vector<8x8xf32>
      %64 = arith.subf %63, %44 : vector<8x8xf32>
      %65 = arith.mulf %64, %57 : vector<8x8xf32>
      %66 = arith.mulf %62, %62 : vector<8x8xf32>
      %67 = arith.mulf %44, %66 : vector<8x8xf32>
      %68 = arith.addf %65, %67 : vector<8x8xf32>
      %c0_45 = arith.constant 0 : index
      %c0_46 = arith.constant 0 : index
      %69 = vector.load %arg10[%c0_45, %c0_46] : memref<1x1xf32, #tpu.memory_space<vmem>>, vector<1x1xf32>
      %70 = vector.shape_cast %68 : vector<8x8xf32> to vector<1x8x8xf32>
      %cst_47 = arith.constant dense<0.000000e+00> : vector<1xf32>
      %71 = vector.multi_reduction <add>, %70, %cst_47 [1, 2] : vector<1x8x8xf32> to vector<1xf32>
      %72 = vector.shape_cast %71 : vector<1xf32> to vector<1x1x1xf32>
      %73 = vector.extract %72[0, 0, 0] : f32 from vector<1x1x1xf32>
      %74 = vector.broadcast %73 : f32 to vector<1x1xf32>
      %75 = arith.addf %69, %74 : vector<1x1xf32>
      %c0_48 = arith.constant 0 : index
      %c0_49 = arith.constant 0 : index
      %76 = vector.load %arg10[%c0_48, %c0_49] : memref<1x1xf32, #tpu.memory_space<vmem>>, vector<1x1xf32>
      tpu.vector_store %arg10[%c0_48, %c0_49], %75 {strides = array<i32>} : memref<1x1xf32, #tpu.memory_space<vmem>>, vector<1x1xf32>,
    } else {
    }
    %c0_i32_27 = arith.constant 0 : i32
    %37 = arith.cmpi eq, %arg0, %c0_i32_27 : i32
    %c0_i32_28 = arith.constant 0 : i32
    %38 = arith.cmpi eq, %arg1, %c0_i32_28 : i32
    %39 = arith.andi %37, %38 : i1
    %c0_i32_29 = arith.constant 0 : i32
    %40 = arith.cmpi eq, %arg2, %c0_i32_29 : i32
    %41 = arith.andi %39, %40 : i1
    %42 = arith.extui %41 : i1 to i32
    %c0_i32_30 = arith.constant 0 : i32
    %43 = arith.cmpi ne, %42, %c0_i32_30 : i32
    scf.if %43 {
      %c0_31 = arith.constant 0 : index
      %c0_32 = arith.constant 0 : index
      %44 = vector.load %arg10[%c0_31, %c0_32] : memref<1x1xf32, #tpu.memory_space<vmem>>, vector<1x1xf32>
      %cst_33 = arith.constant 1.250000e-01 : f32
      %45 = vector.broadcast %cst_33 : f32 to vector<1x1xf32>
      %46 = arith.mulf %44, %45 : vector<1x1xf32>
      %c0_34 = arith.constant 0 : index
      %c0_35 = arith.constant 0 : index
      %47 = vector.load %arg6[%c0_34, %c0_35] : memref<1x1xf32, #tpu.memory_space<vmem>>, vector<1x1xf32>
      tpu.vector_store %arg6[%c0_34, %c0_35], %46 {strides = array<i32>} : memref<1x1xf32, #tpu.memory_space<vmem>>, vector<1x1xf32>,
    } else {
    }
    return
  }
  func.func @transform_0(%arg0: i32, %arg1: i32, %arg2: i32) -> (i32, i32) {
    %c0_i32 = arith.constant 0 : i32
    return %arg0, %arg2 : i32, i32
  }
  func.func @transform_1(%arg0: i32, %arg1: i32, %arg2: i32) -> (i32, i32) {
    %c0_i32 = arith.constant 0 : i32
    return %arg1, %arg2 : i32, i32
  }
  func.func @transform_2(%arg0: i32, %arg1: i32, %arg2: i32) -> (i32, i32) {
    %c0_i32 = arith.constant 0 : i32
    return %arg0, %arg1 : i32, i32
  }
  func.func @transform_3(%arg0: i32, %arg1: i32, %arg2: i32) -> (i32, i32) {
    %c0_i32 = arith.constant 0 : i32
    %c0_i32_0 = arith.constant 0 : i32
    %c0_i32_1 = arith.constant 0 : i32
    return %c0_i32, %c0_i32_0 : i32, i32
  }
}

</mosaic_0001>

<bundles_post_ra>
// kernel: tpu_custom_call.1
= control target key start
LH: loop header
LB: loop body
LE: loop exit
PB: predicated region body
PF: predicated region fallthrough
CT: control target
= control target key end

     0   :  { %8 = vsyncpa [#allocation7], 0  ;;  %s384_s0 = inlined_call_operand.hbm [shape: f32[8,128], index: 0, kind: input, shape index: {}]   ;;  %s385_s1 = inlined_call_operand.hbm [shape: f32[8,128], index: 1, kind: input, shape index: {}]   ;;  %s386_s2 = inlined_call_operand.hbm [shape: f32[8,8], index: 2, kind: input, shape index: {}]   ;;  %s387_s3 = inlined_call_operand.hbm [shape: f32[1,1], index: 3, kind: output, shape index: {}]  }
   0x1   :  { %9 = vsyncpa [#allocation10], 0  ;;  %s27_s14 = sshll.u32 %s385_s1, 4  ;;  %s28_s14 = int_to_ptr.hbm [resolvable:$true] %s27_s14 }
   0x2   :  { %10 = vsyncpa [#allocation8], 0  ;;  %s331_s15 = smov [#allocation9]   ;;  %s16_s19 = sshll.u32 %s384_s0, 4  ;;  %s17_s19 = int_to_ptr.hbm [resolvable:$true] %s16_s19 }
   0x3   :  { %s29_s16 = sshll.u32 %s331_s15, 4  ;;  %s332_s20 = smov [#allocation6]   ;;  %s30_s16 = int_to_ptr.vmem [resolvable:$true] %s29_s16 }
   0x4   :  { %32 = dma.hbm_to_vmem [thread:$0]  %s28_s14, 128, %s30_s16, [#allocation10]  }
   0x5   :  { %s18_s21 = sshll.u32 %s332_s20, 4  ;;  %s38_s24 = sshll.u32 %s386_s2, 4  ;;  %s19_s21 = int_to_ptr.vmem [resolvable:$true] %s18_s21  ;;  %s39_s24 = int_to_ptr.hbm [resolvable:$true] %s38_s24 }
   0x6   :  { %21 = dma.hbm_to_vmem [thread:$0]  %s17_s19, 128, %s19_s21, [#allocation7]  }
   0x7   :  { %s333_s1 = smov [#allocation11]  }
   0x8   :  { %s40_s25 = sshll.u32 %s333_s1, 4  ;;  %s41_s25 = int_to_ptr.vmem [resolvable:$true] %s40_s25 }
   0x9   :  { %43 = dma.hbm_to_vmem [thread:$0]  %s39_s24, 128, %s41_s25, [#allocation10]  }
   0xa   :  { %325 = dma.done.wait [#allocation7], 128  }
   0xb   :  { %326 = vsyncadd [#allocation7], 4294967168 }
   0xc   :  { %327 = dma.done.wait [#allocation10], 256  }
   0xd   :  { %328 = vsyncadd [#allocation10], 4294967040  ;;  %vm72_vm0 = vcmask 7168   ;;  %v334_v0 = vmov 0.0   ;;  %v76_v1 = vld [vmem:[#allocation6] sm:$0xff]  ;;  %v77_v2 = vld [vmem:[#allocation9] sm:$0xff] }
   0xe   :  { %73 = vst.msk [vmem:[#allocation3] sm:$0xff] %vm72_vm0, %v334_v0  ;;  %v103_v3 = vmul.f32 %v76_v1, %v76_v1  ;;  %v104_v4 = vmul.f32 2e-06, %v76_v1  ;;  %v112_v5 = vmul.f32 %v77_v2, %v77_v2  ;;  %v113_v6 = vmul.f32 2e-06, %v77_v2  ;;  %94 = vmatpush.xpose.msra.mxu0 %v77_v2  ;;  %v141_v38 = vld [vmem:[#allocation11] sm:$0xff] }
   0xf   :  { %v335_v9 = vmov 1.0   ;;  %v336_v10 = vmov 0   ;;  %vm74_vm1 = vcmask 57344   ;;  %vm70_vm2 = vcmask 64512   ;;  %s337_s2 = smov [#allocation12]   ;;  %s205_s29 = sshll.u32 %s387_s3, 4  ;;  %s206_s29 = int_to_ptr.hbm [resolvable:$true] %s205_s29 }
  0x10   :  { %v105_v7 = vadd.f32 %v104_v4, %v103_v3  ;;  %v114_v8 = vsub.f32 %v112_v5, %v113_v6  ;;  %225 = vset.pattern.permute.xlu0 %v336_v10  ;;  %75 = vst.msk [vmem:[#allocation4] sm:$0x1] %vm74_vm1, %v334_v0  ;;  %v172_v42 = vsub.f32 1.0, %v141_v38  ;;  %vm65_vm5 = vcmask 0   ;;  %s203_s26 = sshll.u32 %s337_s2, 4  ;;  %s204_s26 = int_to_ptr.vmem [resolvable:$true] %s203_s26 }
  0x11   :  { %95 = vmatmul.f32.vlgmr.msra.gmra.mxu0 %v76_v1  ;;  %71 = vst.msk [vmem:[#allocation2] sm:$0xff] %vm70_vm2, %v334_v0 }
  0x12   :  { %106 = vadd.xlane.f32.xlu0 %v105_v7  ;;  %130 = vmatpush.xpose.msra.mxu1 %v114_v8  ;;  %66 = vst.msk [vmem:[#allocation5] sm:$0x1] %vm65_vm5, %v334_v0 }
  0x15   :  { %131 = vmatmul.f32.vlgmr.msra.gmra.mxu1 %v335_v9  ;;  %v102_v11 = vld [vmem:[#allocation3] sm:$0xff] }
  0x17   :  { %v111_v18 = vld [vmem:[#allocation4] sm:$0x1] }
  0x18   :  { %v78_v14 = vld [vmem:[#allocation2] sm:$0xff] }
  0x19   :  { %v177_v55 = vld [vmem:[#allocation5] sm:$0x1] }
  0x85   :  { %v107_v12 = vpop.xlane.xlu0 %106 }
  0x86   :  { %v108_v13 = vadd.f32 %v107_v12, %v102_v11 }
  0x88   :  { %110 = vst.msk [vmem:[#allocation3] sm:$0xff] %vm72_vm0, %v108_v13 }
  0x8e   :  { %v96_v15 = vpop.f32.mrf.mxu0 }
  0x8f   :  { %v142_v16 = vld [vmem:[#allocation3] sm:$0xff]  ;;  %v99_v17 = vadd.f32 %v96_v15, %v78_v14 }
  0x90   :  { %146 = vperm.xlu0 %225, %v142_v16  }
  0x91   :  { %101 = vst.msk [vmem:[#allocation2] sm:$0xff] %vm70_vm2, %v99_v17 }
  0x92   :  { %v132_v19 = vpop.f32.mrf.mxu1 }
  0x93   :  { %v135_v20 = vadd.f32 %v132_v19, %v111_v18 }
  0x95   :  { %137 = vst.msk [vmem:[#allocation4] sm:$0x1] %vm74_vm1, %v135_v20 }
  0x98   :  { %v153_v21 = vld [vmem:[#allocation2] sm:$0xff] }
  0x99   :  { %v154_v23 = vmul.f32 2.0, %v153_v21 }
  0x9c   :  { %v226_v22 = vld [vmem:[#allocation4] ss:$0 sm:$0xff] }
 0x102   :  { %v147_v24 = vpop.permute.xlu0 %146 }
 0x103   :  { %v152_v25 = vadd.f32 %v226_v22, %v147_v24 }
 0x105   :  { %v155_v26 = vsub.f32 %v152_v25, %v154_v23 }
 0x107   :  { %v156_v27 = vadd.f32 3.2e-11, %v155_v26 }
 0x109   :  { %v157_v28 = vmax.f32 %v156_v27, 0.0 }
 0x10b   :  { %227 = vrsqrt.f32 %v157_v28  ;;  %vm165_vm3 = vcmp.eq.f32.partialorder %v157_v28, inf  ;;  %v168_v36 = vand.u32 2147483648, %v157_v28  ;;  %vm167_vm4 = vcmp.eq.f32.partialorder %v157_v28, 0.0 }
 0x10c   :  { %v173_v44 = vmul.f32 %v172_v42, %v157_v28 }
 0x111   :  { %v228_v29 = vpop.eup %227 }
 0x112   :  { %v159_v30 = vmul.f32 %v228_v29, %v157_v28 }
 0x114   :  { %v160_v31 = vmul.f32 %v228_v29, %v159_v30 }
 0x116   :  { %v161_v32 = vmul.f32 0.5, %v160_v31 }
 0x118   :  { %v162_v33 = vsub.f32 1.5, %v161_v32 }
 0x11a   :  { %v163_v34 = vmul.f32 %v228_v29, %v162_v33 }
 0x11c   :  { %v164_v35 = vmul.f32 %v163_v34, %v157_v28 }
 0x11e   :  { %v166_v37 = vsel %vm165_vm3, %v157_v28, %v164_v35 }
 0x11f   :  { %v169_v39 = vsel %vm167_vm4, %v168_v36, %v166_v37 }
 0x120   :  { %v170_v40 = vsub.f32 2.0, %v169_v39 }
 0x122   :  { %v171_v41 = vmax.f32 %v170_v40, 0.0 }
 0x124   :  { %v174_v43 = vmul.f32 %v171_v41, %v171_v41 }
 0x126   :  { %v175_v45 = vmul.f32 %v174_v43, %v141_v38 }
 0x128   :  { %v176_v46 = vadd.f32 %v175_v45, %v173_v44 }
 0x12a   :  { %v178_v47 = vsel %vm70_vm2, %v176_v46, 0.0 }
 0x12b   :  { %179 = vadd.xlane.f32.xlu1 %v178_v47 }
 0x19e   :  { %v180_v48 = vpop.xlane.xlu1 %179 }
 0x19f   :  { %v181_v49 = vrot.slane %v180_v48, 4 }
 0x1a1   :  { %v182_v50 = vadd.f32 %v181_v49, %v180_v48 }
 0x1a3   :  { %v183_v51 = vrot.slane %v182_v50, 2 }
 0x1a5   :  { %v184_v52 = vadd.f32 %v183_v51, %v182_v50 }
 0x1a7   :  { %v185_v53 = vrot.slane %v184_v52, 1 }
 0x1a9   :  { %v186_v54 = vadd.f32 %v185_v53, %v184_v52 }
 0x1ab   :  { %216 = vpush %v186_v54 }
 0x1dc   :  { %s217_s0 = spop %216 }
 0x1dd   :  { %v188_v56 = vstv %s217_s0 }
 0x1de   :  { %v189_v57 = vadd.f32 %v188_v56, %v177_v55 }
 0x1e0   :  { %191 = vst.msk [vmem:[#allocation5] sm:$0x1] %vm65_vm5, %v189_v57 }
 0x1e7   :  { %v194_v58 = vld [vmem:[#allocation5] sm:$0x1] }
 0x1e8   :  { %v195_v59 = vmul.f32 0.125, %v194_v58 }
 0x1ea   :  { %197 = vst.msk [vmem:[#allocation12] sm:$0x1] %vm65_vm5, %v195_v59 }
 0x1eb   :  { %208 = dma.vmem_to_hbm [thread:$0]  %s204_s26, 16, %s206_s29, [#allocation8]  }
 0x1ec   :  { %329 = dma.done.wait [#allocation8], 16  }
 0x1ed   :  { %330 = vsyncadd [#allocation8], 4294967280 }
 0x1ee   :  { %213 = vsyncpa [#allocation7], 1 }
 0x1ef   :  { %214 = vsyncpa [#allocation10], 1 }
 0x1f0   :  { %215 = vsyncpa [#allocation8], 1 }

</bundles_post_ra>
